<compile_context>
chip_gen: v7x
topology: tpu7x:2x2x1
jax: 0.10.0
libtpu: 0.0.40
codegen_flags: <defaults>
</compile_context>

<pallas_src>
import functools

import numpy as np
import jax
import jax.numpy as jnp
from jax import lax
from jax.experimental import pallas as pl
from jax.experimental.pallas import tpu as pltpu


# ----------------------------------------------------------------------------
# Static permutation tables (identical to the PyTorch module's __init__)
# ----------------------------------------------------------------------------
PERM = (
    np.array([0, 5, 1, 9, 13, 17, 6, 2, 10, 14, 18, 7, 3, 11, 15, 19, 8, 4, 12, 16, 20])[:, None]
    + np.arange(3)[None, :]
).flatten()                      # length 63, values in [0, 22]
INV_PERM = np.argsort(PERM)      # length 63, values in [0, 62]

# Default batch tile: ~16 MiB of double-buffered VMEM at 128 padded lanes
# (f32), large enough that each grid step is HBM-DMA-limited rather than
# per-step-overhead-limited on v5e/v6e/v7x.
_DEFAULT_BLOCK_ROWS = 8192
# Batches above this (but below one tile) are split into 2 blocks so the grid
# has work for both v7x TensorCores.
_MIN_SPLIT_ROWS = 2048
# Covers v5e's 16 MiB default scoped VMEM; leaves ~32 MiB headroom on v7x
# (64 MiB physical per TC).  v6e (128 MiB physical) trivially fine.
_VMEM_LIMIT_BYTES = 32 << 20


def _sublane_multiple(dtype) -> int:
    """Native packed-sublane multiple for a dtype (8 for f32, 16 for bf16, ...)."""
    itemsize = np.dtype(dtype).itemsize
    return max(8, 32 // max(itemsize, 1))


@functools.lru_cache(maxsize=None)
def _selection_matrix_np(num_in_features: int, mode: str) -> np.ndarray:
    """One-hot matrix P with P[perm[j], j] = 1, so (x @ P)[:, j] == x[:, perm[j]]."""
    perm = PERM if mode == "direct" else INV_PERM
    p = np.zeros((num_in_features, perm.shape[0]), dtype=np.float32)
    p[perm, np.arange(perm.shape[0])] = 1.0
    return p


# ----------------------------------------------------------------------------
# Pallas kernel: permuted gather via MXU matmul (native dtype in, f32 accum)
# ----------------------------------------------------------------------------
def _hand_order_kernel(x_ref, p_ref, y_ref, *, precision):
    # y[:, j] = x[:, perm[j]]  (exact: one-hot matmul, f32 accumulation)
    y = jnp.dot(x_ref[...], p_ref[...],
                preferred_element_type=jnp.float32, precision=precision)
    y_ref[...] = y.astype(y_ref.dtype)


def hand_order_forward(inputs: jnp.ndarray, mode: str = "direct",
                       block_rows: int = _DEFAULT_BLOCK_ROWS):
    """JAX/Pallas equivalent of HandOrder.forward.

    inputs: (B, F) floating-point array.
      mode == 'direct':  F must cover max(PERM)+1 == 23; output is (B, 63)
      mode == 'inverse': F must cover max(INV_PERM)+1 == 63; output is (B, 63)
    returns (permuted_inputs, zeros(B, 1) float32)
    """
    perm = PERM if mode == "direct" else INV_PERM
    b, f = inputs.shape
    need = int(perm.max()) + 1
    if f < need:
        raise ValueError(f"mode={mode!r} requires at least {need} features, got {f}")
    if not jnp.issubdtype(inputs.dtype, jnp.floating):
        # TODO(synk): integer inputs would need a direct-copy path (the f32 MXU
        # gather is only exact up to 2^24); the flow only ever feeds float joints.
        raise TypeError(f"hand_order_forward expects a floating dtype, got {inputs.dtype}")

    out_f = int(perm.shape[0])
    itemsize = np.dtype(inputs.dtype).itemsize

    # Selection matrix in the input's *native* dtype (cached per (F, mode)):
    # no extra cast pass over (B, F); one-hot matmul stays exact via f32 accum.
    sel = jnp.asarray(_selection_matrix_np(f, mode), dtype=inputs.dtype)

    # Batch tile selection:
    #   * tiny batches -> one full block,
    #   * medium batches -> split in 2 so the v7x megacore has >=2 grid steps,
    #   * large batches -> block_rows, rounded to the dtype's sublane multiple.
    sub = _sublane_multiple(inputs.dtype)
    if b <= _MIN_SPLIT_ROWS:
        tb = b
    elif b <= block_rows:
        tb = ((((b + 1) // 2) + sub - 1) // sub) * sub
    else:
        tb = max(sub, (block_rows // sub) * sub)
    grid = (pl.cdiv(b, tb),)

    # Pin f32 dots to HIGHEST so the one-hot gather is bit-exact (default TPU
    # precision may compute f32 matmuls via bf16 passes).  Extra MXU passes are
    # hidden: the kernel is HBM-bound.
    precision = lax.Precision.HIGHEST if inputs.dtype == jnp.float32 else None

    cost = pl.CostEstimate(
        flops=2 * b * f * out_f,
        transcendentals=0,
        bytes_accessed=(b * (f + out_f) + f * out_f) * itemsize,
    )

    y = pl.pallas_call(
        functools.partial(_hand_order_kernel, precision=precision),
        out_shape=jax.ShapeDtypeStruct((b, out_f), inputs.dtype),
        grid=grid,
        in_specs=[
            pl.BlockSpec((tb, f), lambda i: (i, 0)),      # streamed batch tiles
            pl.BlockSpec((f, out_f), lambda i: (0, 0)),   # resident selection matrix
        ],
        out_specs=pl.BlockSpec((tb, out_f), lambda i: (i, 0)),
        compiler_params=pltpu.CompilerParams(
            # Batch tiles are independent: let v7x shard the grid over its 2 TCs.
            dimension_semantics=("parallel",),
            vmem_limit_bytes=_VMEM_LIMIT_BYTES,
        ),
        cost_estimate=cost,
    )(inputs, sel)

    # Zero log-det stays in plain XLA: keeping it out of the kernel avoids a
    # 1-lane-wide masked-store output stream competing with the real output.
    logdet = jnp.zeros((b, 1), jnp.float32)
    return y, logdet


# JIT'd entry point (mode / block_rows are static).
hand_order_forward_jit = jax.jit(hand_order_forward,
                                 static_argnames=("mode", "block_rows"))


# ----------------------------------------------------------------------------
# Demo / self-check
# ----------------------------------------------------------------------------
if __name__ == "__main__":
    key = jax.random.PRNGKey(0)
    B = 8
    NUM_INPUTS = 23  # max(PERM) + 1; matches what the module's forward implies

    x = jax.random.normal(key, (B, NUM_INPUTS), dtype=jnp.float32)

    # direct mode, single block, f32 (HIGHEST precision -> bit-exact gather)
    y, logdet = hand_order_forward_jit(x, mode="direct")
    y = jax.block_until_ready(y)
    logdet = jax.block_until_ready(logdet)
    y_ref = np.asarray(x)[:, PERM]
    assert y.shape == (B, PERM.shape[0])
    assert logdet.shape == (B, 1) and logdet.dtype == jnp.float32
    assert np.array_equal(np.asarray(y), y_ref), "direct-mode gather mismatch"
    assert np.all(np.asarray(logdet) == 0.0)

    # inverse mode (operates on 63-wide features, as in the reference module)
    key2 = jax.random.PRNGKey(1)
    x2 = jax.random.normal(key2, (B, PERM.shape[0]), dtype=jnp.float32)
    y2, logdet2 = hand_order_forward_jit(x2, mode="inverse")
    y2 = jax.block_until_ready(y2)
    assert np.array_equal(np.asarray(y2), np.asarray(x2)[:, INV_PERM]), \
        "inverse-mode gather mismatch"
    assert np.all(np.asarray(jax.block_until_ready(logdet2)) == 0.0)

    # tiled path (small block_rows forces a multi-step grid) + native bf16 input.
    # block_rows is a multiple of 16 (bf16 native sublane packing).
    key3 = jax.random.PRNGKey(2)
    B3 = 40
    x3 = jax.random.normal(key3, (B3, NUM_INPUTS), dtype=jnp.bfloat16)
    y3, logdet3 = hand_order_forward_jit(x3, mode="direct", block_rows=16)
    y3 = jax.block_until_ready(y3)
    assert y3.dtype == jnp.bfloat16 and y3.shape == (B3, PERM.shape[0])
    assert bool(jnp.array_equal(y3, x3[:, PERM])), "tiled bf16 gather mismatch"
    assert np.all(np.asarray(jax.block_until_ready(logdet3)) == 0.0)

    # medium-batch path (exercises the 2-way split used for v7x megacore)
    key4 = jax.random.PRNGKey(3)
    B4 = 4096
    x4 = jax.random.normal(key4, (B4, NUM_INPUTS), dtype=jnp.float32)
    y4, _ = hand_order_forward_jit(x4, mode="direct")
    y4 = jax.block_until_ready(y4)
    assert np.array_equal(np.asarray(y4), np.asarray(x4)[:, PERM]), \
        "split-grid gather mismatch"

    print("KERNEL_OK")
</pallas_src>

<mosaic_0001>
module attributes {stable_mosaic.version = 11 : i64} {
  func.func @_hand_order_kernel(%arg0: i32, %arg1: memref<8x23xf32, #tpu.memory_space<vmem>>, %arg2: memref<23x63xf32, #tpu.memory_space<vmem>>, %arg3: memref<8x63xf32, #tpu.memory_space<vmem>>) attributes {dimension_semantics = [#tpu.dimension_semantics<parallel>], iteration_bounds = array<i64: 1>, scalar_prefetch = 0 : i64, scratch_operands = 0 : i64, tpu.core_type = #tpu.core_type<tc>, window_params = [{transform_indices = @transform_0, window_bounds = array<i64: 8, 23>}, {pipeline_mode = #tpu.pipeline_mode<synchronous>, transform_indices = @transform_1, window_bounds = array<i64: 23, 63>}, {transform_indices = @transform_2, window_bounds = array<i64: 8, 63>}]} {
    %c0 = arith.constant 0 : index
    %c0_0 = arith.constant 0 : index
    %0 = vector.load %arg1[%c0, %c0_0] : memref<8x23xf32, #tpu.memory_space<vmem>>, vector<8x23xf32>
    %c0_1 = arith.constant 0 : index
    %c0_2 = arith.constant 0 : index
    %1 = vector.load %arg2[%c0_1, %c0_2] : memref<23x63xf32, #tpu.memory_space<vmem>>, vector<23x63xf32>
    %cst = arith.constant dense<0.000000e+00> : vector<8x63xf32>
    %2 = tpu.matmul %0, %1, %cst {dimension_numbers = #tpu.dot_dimension_numbers<[1], [0], [0], [1], [0, 0, 1, 1], [], []>, precision = #tpu.contract_precision<fp32>} : vector<8x23xf32>, vector<23x63xf32>, vector<8x63xf32> -> vector<8x63xf32>
    %c0_3 = arith.constant 0 : index
    %c0_4 = arith.constant 0 : index
    %3 = vector.load %arg3[%c0_3, %c0_4] : memref<8x63xf32, #tpu.memory_space<vmem>>, vector<8x63xf32>
    tpu.vector_store %arg3[%c0_3, %c0_4], %2 {strides = array<i32>} : memref<8x63xf32, #tpu.memory_space<vmem>>, vector<8x63xf32>,
    return
  }
  func.func @transform_0(%arg0: i32) -> (i32, i32) {
    %c0_i32 = arith.constant 0 : i32
    %c0_i32_0 = arith.constant 0 : i32
    return %arg0, %c0_i32 : i32, i32
  }
  func.func @transform_1(%arg0: i32) -> (i32, i32) {
    %c0_i32 = arith.constant 0 : i32
    %c0_i32_0 = arith.constant 0 : i32
    %c0_i32_1 = arith.constant 0 : i32
    return %c0_i32, %c0_i32_0 : i32, i32
  }
  func.func @transform_2(%arg0: i32) -> (i32, i32) {
    %c0_i32 = arith.constant 0 : i32
    %c0_i32_0 = arith.constant 0 : i32
    return %arg0, %c0_i32 : i32, i32
  }
}

</mosaic_0001>

<bundles_post_ra>
// kernel: hand_order_forward.1
= control target key start
LH: loop header
LB: loop body
LE: loop exit
PB: predicated region body
PF: predicated region fallthrough
CT: control target
= control target key end

     0   :  { %7 = vsyncpa [#allocation3], 0  ;;  %s797_s0 = inlined_call_operand.hbm [shape: f32[8,23], index: 0, kind: input, shape index: {}]   ;;  %s798_s1 = inlined_call_operand.hbm [shape: f32[23,63], index: 1, kind: input, shape index: {}]   ;;  %s799_s2 = inlined_call_operand.hbm [shape: f32[8,63], index: 2, kind: output, shape index: {}]  }
   0x1   :  { %8 = vsyncpa [#allocation6], 0 }
   0x2   :  { %9 = vsyncpa [#allocation4], 0  ;;  %s725_s9 = smov [#allocation2]   ;;  %s726_s11 = smov [#allocation5]  }
   0x3   :  { %s16_s10 = sshll.u32 %s725_s9, 4  ;;  %s25_s12 = sshll.u32 %s726_s11, 4  ;;  %s17_s10 = int_to_ptr.vmem [resolvable:$true] %s16_s10  ;;  %s748_s12 = int_to_ptr.vmem [resolvable:$true] %s25_s12 }
   0x4   :  { %s653_s15 = scalar_lea.hbm %s797_s0, 128 }
   0x5   :  { %p654_p0 = scmp.ne.s32.totalorder %s797_s0, %s653_s15  ;;  %p657_p1 = scmp.lt.u32.totalorder %s653_s15, %s797_s0 }
   0x7   :  { %p659_p2 = pnand %p657_p1, %p654_p0 }
   0x9   :  { %662 = shalt.err (!%p659_p2)
}
   0xa   :  { %s663_s20 = scalar_lea.vmem %s17_s10, 128  ;;  %p668_p4 = scmp.lt.s32.totalorder %s17_s10, %s17_s10 }
   0xb   :  { %p664_p3 = scmp.ne.s32.totalorder %s17_s10, %s663_s20  ;;  %p669_p5 = scmp.lt.s32.totalorder %s663_s20, %s663_s20 }
   0xd   :  { %p670_p6 = por %p669_p5, %p668_p4 }
   0xf   :  { %p671_p7 = pnand %p670_p6, %p664_p3 }
  0x11   :  { %674 = shalt.err (!%p671_p7)
}
  0x12   :  { %19 = dma.hbm_to_vmem [thread:$0]  %s797_s0, 128, %s17_s10, [#allocation3]  }
  0x13   :  { %s675_s25 = scalar_lea.hbm %s798_s1, 384 }
  0x14   :  { %p676_p8 = scmp.ne.s32.totalorder %s798_s1, %s675_s25  ;;  %p679_p9 = scmp.lt.u32.totalorder %s675_s25, %s798_s1 }
  0x16   :  { %p681_p10 = pnand %p679_p9, %p676_p8 }
  0x18   :  { %684 = shalt.err (!%p681_p10)
}
  0x19   :  { %s685_s30 = scalar_lea.vmem %s748_s12, 384  ;;  %p690_p12 = scmp.lt.s32.totalorder %s748_s12, %s748_s12 }
  0x1a   :  { %p686_p11 = scmp.ne.s32.totalorder %s748_s12, %s685_s30  ;;  %p691_p13 = scmp.lt.s32.totalorder %s685_s30, %s685_s30 }
  0x1c   :  { %p692_p0 = por %p691_p13, %p690_p12 }
  0x1e   :  { %p693_p1 = pnand %p692_p0, %p686_p11 }
  0x20   :  { %696 = shalt.err (!%p693_p1)
}
  0x21   :  { %s727_s0 = smov 128   ;;  %s728_s3 = smov 8  }
  0x22   :  { %31 = dma.hbm_to_vmem [thread:$0]  %s798_s1, 384, %s748_s12, [#allocation6], %s727_s0, %s727_s0, %s728_s3  }
  0x23   :  { %719 = dma.done.wait [#allocation3], 128  }
  0x24   :  { %720 = vsyncadd [#allocation3], 4294967168 }
  0x25   :  { %721 = dma.done.wait [#allocation6], 384  }
  0x26   :  { %722 = vsyncadd [#allocation6], 4294966912  ;;  %v729_v0 = vmov 0.0|0.0   ;;  %vm730_vm0 = vmmov 0   ;;  %v731_v1 = vmov 0.0   ;;  %vm46_vm1 = vcmask 1046528  }
  0x27   :  { %627 = vmatprep.subr.bf16.mxu0 %v729_v0  ;;  %618 = vmatprep.subr.bf16.mxu1 %v729_v0  ;;  %vm42_vm2 = vcmask 187392   ;;  %v39_v2 = vld [vmem:[#allocation5] sm:$0xff]  ;;  %v40_v3 = vld [vmem:[#allocation5 + $0x8] sm:$0xff]  ;;  %v41_v4 = vld [vmem:[#allocation5 + $0x10] sm:$0x7f]  ;;  %s732_s1 = smov [#allocation7]  }
  0x28   :  { %597 = vmatprep.mubr.msk.f32.mxu0 %vm730_vm0, %v731_v1  ;;  %570 = vmatprep.mubr.msk.f32.mxu1 %vm730_vm0, %v731_v1  ;;  %v51_v5 = vand.u32 4294901760, %v39_v2  ;;  %v54_v6 = vand.u32 4294901760, %v40_v3  ;;  %v48_v7 = vsel %vm46_vm1, %v41_v4, 0  ;;  %v38_v8 = vld [vmem:[#allocation2] sm:$0xff]  ;;  %s530_s6 = sshll.u32 %s732_s1, 4  ;;  %vm522_vm3 = vcmask 515072   ;;  %s531_s6 = int_to_ptr.vmem [resolvable:$true] %s530_s6 }
  0x29   :  { %v57_v9 = vand.u32 4294901760, %v48_v7  ;;  %v44_v10 = vsel %vm42_vm2, %v38_v8, 0  ;;  %s697_s7 = scalar_lea.vmem %s531_s6, 128  ;;  %p702_p3 = scmp.lt.s32.totalorder %s531_s6, %s531_s6 }
  0x2a   :  { %v619_v11 = vpack.c.bf16 %v54_v6, %v51_v5  ;;  %v130_v12 = vsub.f32 %v39_v2, %v51_v5  ;;  %v137_v13 = vsub.f32 %v40_v3, %v54_v6  ;;  %v118_v14 = vand.u32 4294901760, %v44_v10  ;;  %p698_p2 = scmp.ne.s32.totalorder %s531_s6, %s697_s7  ;;  %p703_p4 = scmp.lt.s32.totalorder %s697_s7, %s697_s7 }
  0x2b   :  { %v144_v15 = vsub.f32 %v48_v7, %v57_v9 }
  0x2c   :  { %629 = vmatpush3.bf16.msra.mxu0 %v619_v11  ;;  %620 = vmatpush3.bf16.msra.mxu1 %v619_v11  ;;  %v119_v16 = vsub.f32 %v44_v10, %v118_v14  ;;  %v131_v17 = vand.u32 4294901760, %v130_v12  ;;  %v138_v18 = vand.u32 4294901760, %v137_v13  ;;  %v625_v31 = vpack.c.bf16 %v137_v13, %v130_v12  ;;  %p704_p5 = por %p703_p4, %p702_p3 }
  0x2d   :  { %595 = vmatprep.subr.mxu0 %v731_v1  ;;  %568 = vmatprep.subr.mxu1 %v731_v1  ;;  %v145_v19 = vand.u32 4294901760, %v144_v15 }
  0x2e   :  { %v120_v20 = vand.u32 4294901760, %v119_v16  ;;  %v132_v21 = vsub.f32 %v130_v12, %v131_v17  ;;  %v139_v22 = vsub.f32 %v137_v13, %v138_v18  ;;  %v631_v23 = vpack.c.bf16 %v138_v18, %v131_v17  ;;  %p705_p6 = pnand %p704_p5, %p698_p2 }
  0x2f   :  { %v146_v27 = vsub.f32 %v144_v15, %v145_v19 }
  0x30   :  { %596 = vmatpush3.msra.mxu0 %v57_v9  ;;  %569 = vmatpush3.msra.mxu1 %v57_v9  ;;  %v121_v24 = vsub.f32 %v119_v16, %v120_v20  ;;  %v133_v25 = vand.u32 4294901760, %v132_v21  ;;  %v140_v26 = vand.u32 4294901760, %v139_v22 }
  0x31   :  { %598 = vmatmul.mubr.f32.vlgmr.msra.gmra.mrb[0].mxu0 %v120_v20  ;;  %621 = vmatprep.subr.bf16.mxu1 %v729_v0  ;;  %v147_v30 = vand.u32 4294901760, %v146_v27 }
  0x32   :  { %v122_v28 = vand.u32 4294901760, %v121_v24  ;;  %630 = vmatprep.subr.bf16.mxu0 %v729_v0  ;;  %v622_v29 = vpack.c.bf16 %v140_v26, %v133_v25  ;;  %606 = vmatprep.mubr.msk.f32.mxu0 %vm730_vm0, %v731_v1 }
  0x33   :  { %632 = vmatpush3.bf16.msra.mxu0 %v631_v23 }
  0x34   :  { %571 = vmatmul.mubr.f32.vlgmr.msra.gmra.mrb[0].mxu1 %v122_v28  ;;  %604 = vmatprep.subr.mxu0 %v731_v1 }
  0x35   :  { %623 = vmatpush3.bf16.msra.mxu1 %v622_v29  ;;  %579 = vmatprep.mubr.msk.f32.mxu1 %vm730_vm0, %v731_v1 }
  0x36   :  { %577 = vmatprep.subr.mxu1 %v731_v1 }
  0x37   :  { %605 = vmatpush3.msra.mxu0 %v145_v19 }
  0x38   :  { %633 = vmatprep.subr.bf16.mxu0 %v729_v0 }
  0x39   :  { %578 = vmatpush3.msra.mxu1 %v147_v30  ;;  %607 = vmatmul.mubr.f32.vlgmr.msra.gmra.mrb[0].mxu0 %v118_v14 }
  0x3a   :  { %624 = vmatprep.subr.bf16.mxu1 %v729_v0  ;;  %635 = vmatpush3.bf16.msra.mxu0 %v619_v11 }
  0x3b   :  { %613 = vmatprep.subr.mxu0 %v731_v1  ;;  %615 = vmatprep.mubr.msk.f32.mxu0 %vm730_vm0, %v731_v1 }
  0x3c   :  { %580 = vmatmul.mubr.f32.vlgmr.msra.gmra.mrb[0].mxu1 %v118_v14 }
  0x3d   :  { %626 = vmatpush3.bf16.msra.mxu1 %v625_v31  ;;  %588 = vmatprep.mubr.msk.f32.mxu1 %vm730_vm0, %v731_v1 }
  0x3e   :  { %586 = vmatprep.subr.mxu1 %v731_v1  ;;  %614 = vmatpush3.msra.mxu0 %v57_v9 }
  0x41   :  { %587 = vmatpush3.msra.mxu1 %v144_v15  ;;  %616 = vmatmul.mubr.f32.vlgmr.msra.gmra.mrb[0].mxu0 %v118_v14 }
  0x44   :  { %589 = vmatmul.mubr.f32.vlgmr.msra.gmra.mrb[0].mxu1 %v119_v16 }
 0x114   :  { %v518_v32 = vpop.f32.mrb[0].mxu0 }
 0x115   :  { %v617_v33 = vpop.f32.mrb[1].mxu0 }
 0x117   :  { %v288_v34 = vpop.f32.mrb[0].mxu1 }
 0x118   :  { %v636_v35 = vadd.f32 %v518_v32, %v288_v34  ;;  %v590_v36 = vpop.f32.mrb[1].mxu1 }
 0x11a   :  { %523 = vst.msk [vmem:[#allocation7] sm:$0xff] %vm522_vm3, %v636_v35 }
 0x11b   :  { %708 = shalt.err (!%p705_p6)
}
 0x11c   :  { %s709_s10 = scalar_lea.hbm %s799_s2, 128 }
 0x11d   :  { %p710_p7 = scmp.ne.s32.totalorder %s799_s2, %s709_s10  ;;  %p713_p8 = scmp.lt.u32.totalorder %s709_s10, %s799_s2 }
 0x11f   :  { %p715_p9 = pnand %p713_p8, %p710_p7 }
 0x121   :  { %718 = shalt.err (!%p715_p9)
}
 0x122   :  { %533 = dma.vmem_to_hbm [thread:$0]  %s531_s6, 128, %s799_s2, [#allocation4]  }
 0x123   :  { %723 = dma.done.wait [#allocation4], 128  }
 0x124   :  { %724 = vsyncadd [#allocation4], 4294967168 }
 0x125   :  { %537 = vsyncpa [#allocation3], 1 }
 0x126   :  { %538 = vsyncpa [#allocation6], 1 }
 0x127   :  { %539 = vsyncpa [#allocation4], 1 }

</bundles_post_ra>
